<compile_context>
chip_gen: v7x
topology: tpu7x:2x2x1
jax: 0.10.0
libtpu: 0.0.40
codegen_flags: <defaults>
</compile_context>

<pallas_src>
import jax
import jax.numpy as jnp
import numpy as np
from jax.experimental import pallas as pl
from jax.experimental.pallas import tpu as pltpu


def _round_up(x, m):
    return ((x + m - 1) // m) * m


def _gcn_kernel(x_ref, f_ref, b_ref, o_ref):
    """One grid step: (tb, V*C) slab of x -> (tb, V*Cout) slab of output.

    x_ref: (tb, V*C)      input slab, lanes ordered (node v, in-channel c)  [streamed]
    f_ref: (V*C, V*Cout)  fully folded weight sum_k kron(M_k, W_k)          [resident]
    b_ref: (1, V*Cout)    conv bias tiled over nodes                        [resident]
    o_ref: (tb, V*Cout)   output slab, lanes ordered (node v, out-ch o) -- lane dense
    """
    acc = jnp.dot(x_ref[...], f_ref[...], preferred_element_type=jnp.float32)
    o_ref[...] = (acc + b_ref[...]).astype(o_ref.dtype)
    # TODO(synk): dropout is skipped (inference / eval semantics); training-mode dropout
    # would need pltpu.prng_seed + pltpu.stateful_bernoulli on the output slab.


def graph_conv_net_pallas(x, supports, w, b, *, order=2, tb=None,
                          compute_dtype=jnp.bfloat16):
    """x: (N, C, V, L) NCHW.  supports: (S, V, V).  w: (Ctot, Cout).  b: (Cout,)."""
    N, C, V, L = x.shape
    S = supports.shape[0]
    Ctot, Cout = w.shape
    K = order * S + 1
    assert Ctot == K * C

    B = N * L
    VC = V * C
    VCo = V * Cout

    # ---- parameter-only folding (f32, exact, independent of batch) -----------------
    # out[b,(w,o)] = sum_k sum_{v,c} x[b,(v,c)] * M_k[v,w] * W_k[c,o] + bias[o]
    #             = (x @ F)[b,(w,o)] + bias_full[(w,o)],   F = sum_k kron(M_k, W_k)
    f32 = jnp.float32
    mats = [jnp.eye(V, dtype=f32)]                 # piece 0: identity term of the concat
    for s in range(S):
        a = supports[s].astype(f32)
        ak = a
        mats.append(ak)                            # hop 1
        for _ in range(2, order + 1):
            ak = ak @ a
            mats.append(ak)                        # hops 2..order
    F = jnp.zeros((VC, VCo), dtype=f32)
    for k in range(K):
        F = F + jnp.kron(mats[k], w[k * C:(k + 1) * C, :].astype(f32))
    F = F.astype(compute_dtype)
    bias_full = jnp.tile(b.astype(f32), V).reshape(1, VCo)     # bias per (node, out-ch)

    # ---- input layout: NCHW -> (B, V*C), fused with the compute-dtype cast ---------
    xp = jnp.transpose(x, (0, 3, 2, 1)).reshape(B, VC).astype(compute_dtype)

    # ---- batch-tile choice: large tiles, but keep >= 2 grid steps when possible ----
    # (>=2 parallel steps lets v7x's two TensorCores both get work; neutral on v5e/v6e)
    if tb is None:
        tb = max(8, min(2048, _round_up(pl.cdiv(B, 2), 8)))
    tb = min(_round_up(tb, 8), _round_up(B, 8))
    Bp = _round_up(B, tb)
    if Bp != B:
        xp = jnp.pad(xp, ((0, Bp - B), (0, 0)))    # padded rows -> bias-only garbage, sliced off

    # VMEM budget (bf16, double-buffered x/out streams, resident F/bias):
    #   2*tb*VC*2 + 2*tb*VCo*2 + 2*VC*VCo*2 + 2*VCo*4  ~ 4.6 MiB at tb=2048 here,
    # well under the 32 MiB scoped limit requested below (fits v5e/v6e/v7x).
    out = pl.pallas_call(
        _gcn_kernel,
        out_shape=jax.ShapeDtypeStruct((Bp, VCo), compute_dtype),
        grid_spec=pltpu.PrefetchScalarGridSpec(
            num_scalar_prefetch=0,
            grid=(Bp // tb,),
            in_specs=[
                pl.BlockSpec((tb, VC), lambda i: (i, 0)),    # x slab (streamed)
                pl.BlockSpec((VC, VCo), lambda i: (0, 0)),   # folded weight (resident, ~64 KiB)
                pl.BlockSpec((1, VCo), lambda i: (0, 0)),    # bias (resident)
            ],
            out_specs=pl.BlockSpec((tb, VCo), lambda i: (i, 0)),  # lane-dense output
        ),
        compiler_params=pltpu.CompilerParams(
            dimension_semantics=("parallel",),
            vmem_limit_bytes=32 * 1024 * 1024,
        ),
    )(xp, F, bias_full)

    out = out[:B]
    # (B, V*Cout) -> (N, Cout, V, L); final cast back to input dtype fuses with the transpose.
    y = jnp.transpose(out.reshape(N, L, V, Cout), (0, 3, 2, 1))
    return y.astype(x.dtype)


def graph_conv_net_ref(x, supports, w, b, *, order=2):
    """Pure-JAX reference mirroring the PyTorch forward (eval mode)."""
    out = [x]
    for s in range(supports.shape[0]):
        a = supports[s]
        x1 = jnp.einsum("ncvl,vw->ncwl", x, a)
        out.append(x1)
        for _ in range(2, order + 1):
            x2 = jnp.einsum("ncvl,vw->ncwl", x1, a)
            out.append(x2)
            x1 = x2
    h = jnp.concatenate(out, axis=1)
    return jnp.einsum("ncvl,co->novl", h, w) + b[None, :, None, None]


if __name__ == "__main__":
    # small, module-consistent shapes
    N, C_IN, V, L = 2, 4, 16, 16          # batch, channels, nodes, time
    SUPPORT_LEN, ORDER, C_OUT = 3, 2, 32
    C_TOT = (ORDER * SUPPORT_LEN + 1) * C_IN    # 28

    key = jax.random.PRNGKey(0)
    kx, ka, kw, kb = jax.random.split(key, 4)

    x = jax.random.normal(kx, (N, C_IN, V, L), dtype=jnp.float32)

    # row-normalized random adjacency matrices (deterministic)
    a_raw = jax.random.uniform(ka, (SUPPORT_LEN, V, V), dtype=jnp.float32)
    supports = a_raw / jnp.sum(a_raw, axis=-1, keepdims=True)

    # deterministic "Conv2d(c_in_total, c_out, 1x1)" params:
    # torch weight (C_OUT, C_TOT, 1, 1) -> stored here as (C_TOT, C_OUT)
    w_scale = 1.0 / np.sqrt(C_TOT)
    w = jax.random.uniform(
        kw, (C_TOT, C_OUT), dtype=jnp.float32, minval=-w_scale, maxval=w_scale)
    bias = jax.random.uniform(
        kb, (C_OUT,), dtype=jnp.float32, minval=-w_scale, maxval=w_scale)

    y_ref = graph_conv_net_ref(x, supports, w, bias, order=ORDER)

    # f32 path: exact semantics check (tight tolerance)
    y32 = graph_conv_net_pallas(x, supports, w, bias, order=ORDER,
                                compute_dtype=jnp.float32)
    y32 = jax.block_until_ready(y32)
    np.testing.assert_allclose(np.asarray(y32), np.asarray(y_ref), rtol=1e-5, atol=1e-5)

    # default bf16-MXU path (f32 accumulation, bf16 writeback): perf configuration
    y = graph_conv_net_pallas(x, supports, w, bias, order=ORDER)
    y = jax.block_until_ready(y)
    np.testing.assert_allclose(np.asarray(y), np.asarray(y_ref), rtol=2e-2, atol=2e-2)

    assert y.shape == (N, C_OUT, V, L)
    print("KERNEL_OK")
</pallas_src>

<mosaic_0001>
module attributes {stable_mosaic.version = 11 : i64} {
  func.func @_gcn_kernel(%arg0: i32, %arg1: memref<16x64xf32, #tpu.memory_space<vmem>>, %arg2: memref<64x512xf32, #tpu.memory_space<vmem>>, %arg3: memref<1x512xf32, #tpu.memory_space<vmem>>, %arg4: memref<16x512xf32, #tpu.memory_space<vmem>>) attributes {dimension_semantics = [#tpu.dimension_semantics<parallel>], iteration_bounds = array<i64: 2>, scalar_prefetch = 0 : i64, scratch_operands = 0 : i64, tpu.core_type = #tpu.core_type<tc>, window_params = [{transform_indices = @transform_0, window_bounds = array<i64: 16, 64>}, {pipeline_mode = #tpu.pipeline_mode<synchronous>, transform_indices = @transform_1, window_bounds = array<i64: 64, 512>}, {pipeline_mode = #tpu.pipeline_mode<synchronous>, transform_indices = @transform_2, window_bounds = array<i64: 1, 512>}, {transform_indices = @transform_3, window_bounds = array<i64: 16, 512>}]} {
    %c0 = arith.constant 0 : index
    %c0_0 = arith.constant 0 : index
    %0 = vector.load %arg1[%c0, %c0_0] : memref<16x64xf32, #tpu.memory_space<vmem>>, vector<16x64xf32>
    %c0_1 = arith.constant 0 : index
    %c0_2 = arith.constant 0 : index
    %1 = vector.load %arg2[%c0_1, %c0_2] : memref<64x512xf32, #tpu.memory_space<vmem>>, vector<64x512xf32>
    %cst = arith.constant dense<0.000000e+00> : vector<16x512xf32>
    %2 = tpu.matmul %0, %1, %cst {dimension_numbers = #tpu.dot_dimension_numbers<[1], [0], [0], [1], [0, 0, 1, 1], [], []>} : vector<16x64xf32>, vector<64x512xf32>, vector<16x512xf32> -> vector<16x512xf32>
    %c0_3 = arith.constant 0 : index
    %c0_4 = arith.constant 0 : index
    %3 = vector.load %arg3[%c0_3, %c0_4] : memref<1x512xf32, #tpu.memory_space<vmem>>, vector<1x512xf32>
    %4 = vector.broadcast %3 : vector<1x512xf32> to vector<16x512xf32>
    %5 = arith.addf %2, %4 : vector<16x512xf32>
    %c0_5 = arith.constant 0 : index
    %c0_6 = arith.constant 0 : index
    %6 = vector.load %arg4[%c0_5, %c0_6] : memref<16x512xf32, #tpu.memory_space<vmem>>, vector<16x512xf32>
    tpu.vector_store %arg4[%c0_5, %c0_6], %5 {strides = array<i32>} : memref<16x512xf32, #tpu.memory_space<vmem>>, vector<16x512xf32>,
    return
  }
  func.func @transform_0(%arg0: i32) -> (i32, i32) {
    %c0_i32 = arith.constant 0 : i32
    %c0_i32_0 = arith.constant 0 : i32
    return %arg0, %c0_i32 : i32, i32
  }
  func.func @transform_1(%arg0: i32) -> (i32, i32) {
    %c0_i32 = arith.constant 0 : i32
    %c0_i32_0 = arith.constant 0 : i32
    %c0_i32_1 = arith.constant 0 : i32
    return %c0_i32, %c0_i32_0 : i32, i32
  }
  func.func @transform_2(%arg0: i32) -> (i32, i32) {
    %c0_i32 = arith.constant 0 : i32
    %c0_i32_0 = arith.constant 0 : i32
    %c0_i32_1 = arith.constant 0 : i32
    return %c0_i32, %c0_i32_0 : i32, i32
  }
  func.func @transform_3(%arg0: i32) -> (i32, i32) {
    %c0_i32 = arith.constant 0 : i32
    %c0_i32_0 = arith.constant 0 : i32
    return %arg0, %c0_i32 : i32, i32
  }
}

</mosaic_0001>

<bundles_post_ra>
// kernel: tpu_custom_call.1
= control target key start
LH: loop header
LB: loop body
LE: loop exit
PB: predicated region body
PF: predicated region fallthrough
CT: control target
= control target key end

     0   :  { %8 = vsyncpa [#allocation3], 0  ;;  %s1022_s0 = inlined_call_operand.hbm [shape: f32[32,64], index: 0, kind: input, shape index: {}]   ;;  %s1023_s1 = inlined_call_operand.hbm [shape: f32[64,512], index: 1, kind: input, shape index: {}]   ;;  %s1024_s2 = inlined_call_operand.vmem [shape: f32[1,512], index: 2, kind: input, shape index: {}]   ;;  %s1025_s3 = inlined_call_operand.hbm [shape: f32[32,512], index: 3, kind: output, shape index: {}]  }
   0x1   :  { %10 = vsyncpa [#allocation3 + $0x1], 0 }
   0x2   :  { %11 = vsyncpa [#allocation6], 0 }
   0x3   :  { %12 = vsyncpa [#allocation4], 0 }
   0x4   :  { %14 = vsyncpa [#allocation4 + $0x1], 0  ;;  %s809_s12 = smov 0   ;;  %s811_s13 = smov 0  }
   0x5   :  { %s813_s14 = smov 0   ;;  %s815_s15 = smov 0  }
   0x6 LB: > { %s830_s16 = sadd.s32 4294967295, %s777_s15   ;;  %s529_s17 = sadd.s32 4294967294, %s777_s15   ;;  %s777_s15 = sphi %s815_s15, %s1045_s15   ;;  %s773_s14 = sphi %s813_s14, %s1044_s14   ;;  %s769_s13 = sphi %s811_s13, %s1043_s13   ;;  %s765_s12 = sphi %s809_s12, %s1042_s12  }
   0x7   : > { %p40_p0 = scmp.ne.s32.totalorder %s769_s13, %s765_s12  ;;  %p1026_p1 = scmp.eq.s32.totalorder %s830_s16, 0 }
   0x8   : > { %p112_p3 = scmp.eq.s32.totalorder %s529_s17, 1  ;;  %p530_p5 = scmp.ge.s32.totalorder %s777_s15, 1 }
   0x9   : > { %p839_p4 = por %p1026_p1, %p40_p0  ;;  %p119_p7 = scmp.lt.s32.totalorder %s777_s15, 3 }
   0xa   : > { %p844_p6 = por %p112_p3, %p40_p0  ;;  %s779_s21 = smov [#allocation5]  }
   0xb   : > { %s1029_s18 = scalar_select %p839_p4, 1, 0 }
   0xc   : > { %s1030_s19 = scalar_select %p844_p6, 1, 0 }
   0xd   : > { %p849_p8 = pnand %p530_p5, %p119_p7  ;;  %s131_s22 = sshll.u32 %s779_s21, 4  ;;  %s853_s22 = int_to_ptr.vmem [resolvable:$true] %s131_s22 }
   0xe   : > { %s865_s24 = sadd.s32 1, %s777_s15   ;;  %s27_s25 = sadd.s32 1, %s773_s14 }
   0xf   : > { %s1031_s20 = scalar_select %p849_p8, 1, 0 }
  0x10   : > { %p593_p9 = pneg %p849_p8  ;;  %s24_s26 = ssub.s32 %s777_s15, %s865_s24 }
  0x11   : > { %s649_s29 = scalar_lea.hbm %s1023_s1, 4096 }
  0x12   : > { %p860_p11 = pnand %p593_p9, %p1026_p1  ;;  %p650_p12 = scmp.ne.s32.totalorder %s1023_s1, %s649_s29 }
  0x13   : > { %p656_p5 = scmp.lt.u32.totalorder %s649_s29, %s1023_s1 }
  0x14   : > { %p651_p13 = pneg %p860_p11 }
  0x16   : > { %p652_p0 = pnand %p651_p13, %p650_p12 }
  0x18   : > { %p653_p3 = pneg %p652_p0 }
  0x1a   : > { %p658_p7 = pnand %p656_p5, %p653_p3 }
  0x1c   : > { %661 = shalt.err (!%p658_p7)
}
  0x1d   : > { %s662_s7 = scalar_lea.vmem %s853_s22, 4096  ;;  %p670_p2 = scmp.lt.s32.totalorder %s853_s22, %s853_s22 }
  0x1e   : > { %p663_p9 = scmp.ne.s32.totalorder %s853_s22, %s662_s7  ;;  %p671_p6 = scmp.lt.s32.totalorder %s662_s7, %s662_s7 }
  0x20   : > { %p665_p10 = pnand %p663_p9, %p651_p13  ;;  %p672_p4 = por %p671_p6, %p670_p2 }
  0x22   : > { %p666_p1 = pneg %p665_p10 }
  0x24   : > { %p673_p8 = pnand %p672_p4, %p666_p1 }
  0x26   : > { %676 = shalt.err (!%p673_p8)
}
  0x27   : > { %s780_s8 = smov 512   ;;  %s781_s9 = smov 32  }
  0x28   : > { %596 = dma.hbm_to_vmem [thread:$0]  (!%p860_p11), %s1023_s1, 4096, %s853_s22, [#allocation6], %s780_s8, %s780_s8, %s781_s9  }
  0x29   : > { %p25_p2 = scmp.eq.s32.totalorder %s24_s26, 0  ;;  %p34_p1 = scmp.ne.s32.totalorder %s773_s14, %s769_s13 }
  0x2a   : > { %p35_p4 = scmp.eq.s32.totalorder %s777_s15, 0  ;;  %p606_p6 = scmp.lt.s32.totalorder %s777_s15, 2 }
  0x2b   : > { %s896_s17 = scalar_select %p25_p2, %s773_s14, %s27_s25  }
  0x2c   : > { %p36_p8 = por %p35_p4, %p34_p1  ;;  %p1033_p10 = scmp.eq.s32.totalorder %s830_s16, 1 }
  0x2d   : > { %s148_s27 = sand.u32 1, %s773_s14   ;;  %s550_s28 = sshll.u32 %s777_s15, 8 }
  0x2e   : > { %p900_p12 = por %p1033_p10, %p34_p1  ;;  %s533_s29 = sshll.u32 %s148_s27, 4 }
  0x2f   : > { %s909_s4 = scalar_lea.hbm %s1022_s0, %s550_s28  ;;  %s152_s22 = scalar_lea.vmem [#allocation2], %s533_s29 }
  0x30   : > { %s159_s25 = sshll.u32 %s152_s22, 4  ;;  %p911_p11 = pnand %p606_p6, %p36_p8  ;;  %s915_s25 = int_to_ptr.vmem [resolvable:$true] %s159_s25 }
  0x31   : > { %s917_s5 = scalar_lea.sflag [#allocation3], %s148_s27  ;;  %s677_s6 = scalar_lea.hbm %s909_s4, 256 }
  0x32   : > { %p678_p13 = scmp.ne.s32.totalorder %s909_s4, %s677_s6  ;;  %p679_p0 = pneg %p911_p11 }
  0x33   : > { %s682_s9 = scalar_lea.hbm %s1022_s0, 512  ;;  %p683_p7 = scmp.lt.u32.totalorder %s909_s4, %s1022_s0 }
  0x34   : > { %p680_p3 = pnand %p679_p0, %p678_p13  ;;  %p684_p9 = scmp.lt.u32.totalorder %s682_s9, %s677_s6 }
  0x35   : > { %p686_p1 = scmp.lt.u32.totalorder %s677_s6, %s909_s4 }
  0x36   : > { %p681_p5 = pneg %p680_p3  ;;  %p685_p2 = por %p684_p9, %p683_p7 }
  0x38   : > { %p687_p4 = por %p686_p1, %p685_p2 }
  0x3a   : > { %p688_p6 = pnand %p687_p4, %p681_p5 }
  0x3c   : > { %691 = shalt.err (!%p688_p6)
}
  0x3d   : > { %s692_s27 = scalar_lea.vmem %s915_s25, 256  ;;  %s782_s28 = smov [#allocation2]  }
  0x3e   : > { %p693_p8 = scmp.ne.s32.totalorder %s915_s25, %s692_s27  ;;  %s697_s29 = sshll.u32 %s782_s28, 4  ;;  %s698_s29 = int_to_ptr.vmem [resolvable:$false] %s697_s29 }
  0x3f   : > { %s699_s23 = scalar_lea.vmem %s698_s29, 512  ;;  %p700_p3 = scmp.lt.s32.totalorder %s915_s25, %s698_s29 }
  0x40   : > { %p695_p10 = pnand %p693_p8, %p679_p0  ;;  %p701_p7 = scmp.lt.s32.totalorder %s699_s23, %s692_s27 }
  0x42   : > { %p696_p13 = pneg %p695_p10  ;;  %p702_p9 = por %p701_p7, %p700_p3 }
  0x44   : > { %p703_p2 = pnand %p702_p9, %p696_p13 }
  0x46   : > { %706 = shalt.err (!%p703_p2)
}
  0x47   : > { %s783_s30 = smov 128   ;;  %s784_s22 = smov 8  }
  0x48   : > { %600 = dma.hbm_to_vmem [thread:$0]  (!%p911_p11), %s909_s4, 256, %s915_s25, %s917_s5, %s783_s30, %s783_s30, %s784_s22  }
  0x49   : > { %p1036_p0 = scmp.ne.s32.totalorder %s1031_s20, 0 }
  0x4a   : > { %s948_s6 = sand.u32 (!%p1036_p0), 1, %s769_s13   ;;  %p1037_p5 = scmp.ne.s32.totalorder (!%p1036_p0), %s1029_s18, 0 }
  0x4b   : > { %171 = sbr.rel (%p1036_p0) target bundleno = 341 (0x155), region = 32  ;;  %s537_s7 = sshll.u32 (!%p1036_p0), %s948_s6, 4 }
  0x4c   : > { %s174_s8 = scalar_lea.sflag (!%p1036_p0), [#allocation3], %s948_s6  ;;  %s952_s9 = scalar_lea.vmem (!%p1036_p0), [#allocation2], %s537_s7 }
  0x52   : > { %752 = dma.done.wait (%p1037_p5), %s174_s8, 256  }
  0x53   : > { %754 = vsyncadd (%p1037_p5), %s174_s8, 4294967040  ;;  %p1038_p11 = scmp.eq.s32.totalorder %s830_s16, 0 }
  0x55   : > { %756 = dma.done.wait (%p1038_p11), [#allocation6], 4096   ;;  %p1039_p1 = pmov %p1038_p11 }
  0x56   : > { %v785_v0 = vmov 0.0   ;;  %v209_v1 = vld [vmem:[#allocation5 + $0x8] sm:$0xff]  ;;  %v211_v3 = vld [vmem:[#allocation5 + $0x18] sm:$0xff]  ;;  %v208_v6 = vld [vmem:[#allocation5] sm:$0xff]  ;;  %vm262_vm0 = vcmask 523264   ;;  %v242_v51 = vlaneseq  ;;  %s539_s4 = sshll.u32 %s948_s6, 6 }
  0x57   : > { %758 = vsyncadd (%p1039_p1), [#allocation6], 4294963200  ;;  %333 = vmatprep.mubr.f32.mxu0 %v785_v0  ;;  %410 = vmatprep.mubr.f32.mxu1 %v785_v0  ;;  %v213_v2 = vld [vmem:[#allocation5 + $0x28] sm:$0xff]  ;;  %v215_v5 = vld [vmem:[#allocation5 + $0x38] sm:$0xff]  ;;  %s203_s25 = scalar_lea.vmem [#allocation7], %s539_s4  ;;  %s552_s5 = sshll.u32 %s830_s16, 10 }
  0x58   : > { %v553_v4 = vpack.c.bf16 %v213_v2, %v209_v1  ;;  %v212_v7 = vld [vmem:[#allocation5 + $0x20] sm:$0xff]  ;;  %v569_v8 = vpack.c.bf16 %v215_v5, %v211_v3  ;;  %v210_v10 = vld [vmem:[#allocation5 + $0x10] sm:$0xff]  ;;  %v217_v12 = vld [vmem:[#allocation5 + $0x48] sm:$0xff]  ;;  %v243_v52 = vshrl.u32 %v242_v51, 7  ;;  %s446_s26 = sshll.u32 %s203_s25, 4  ;;  %s978_s16 = scalar_lea.hbm %s1025_s3, %s552_s5  ;;  %s973_s26 = int_to_ptr.vmem [resolvable:$true] %s446_s26 }
  0x59   : > { %v555_v9 = vpack.c.bf16 %v212_v7, %v208_v6  ;;  %v214_v11 = vld [vmem:[#allocation5 + $0x30] sm:$0xff]  ;;  %v221_v14 = vld [vmem:[#allocation5 + $0x68] sm:$0xff]  ;;  %v219_v15 = vld [vmem:[#allocation5 + $0x58] sm:$0xff]  ;;  %s432_s27 = scalar_lea.sflag [#allocation4], %s948_s6  ;;  %s707_s28 = scalar_lea.vmem %s973_s26, 1024 }
  0x5a   : > { %554 = vmatprep.subr.bf16.mxu0 %v553_v4  ;;  %v571_v13 = vpack.c.bf16 %v214_v11, %v210_v10  ;;  %v223_v16 = vld [vmem:[#allocation5 + $0x78] sm:$0xff]  ;;  %570 = vmatprep.subr.bf16.mxu1 %v569_v8  ;;  %v557_v17 = vpack.c.bf16 %v221_v14, %v217_v12  ;;  %v216_v19 = vld [vmem:[#allocation5 + $0x40] sm:$0xff]  ;;  %v218_v21 = vld [vmem:[#allocation5 + $0x50] sm:$0xff]  ;;  %v244_v53 = vsub.s32 0, %v243_v52  ;;  %v252_v55 = vsub.s32 2, %v243_v52  ;;  %p708_p4 = scmp.ne.s32.totalorder %s973_s26, %s707_s28  ;;  %s786_s29 = smov [#allocation7]  }
  0x5b   : > { %556 = vmatpush1.bf16.msra.mxu0 %v555_v9  ;;  %v573_v18 = vpack.c.bf16 %v223_v16, %v219_v15  ;;  %v220_v20 = vld [vmem:[#allocation5 + $0x60] sm:$0xff]  ;;  %v222_v23 = vld [vmem:[#allocation5 + $0x70] sm:$0xff]  ;;  %v225_v24 = vld [vmem:[#allocation5 + $0x88] sm:$0xff]  ;;  %v248_v56 = vsub.s32 1, %v243_v52  ;;  %v256_v57 = vsub.s32 3, %v243_v52  ;;  %s711_s23 = sshll.u32 %s786_s29, 4  ;;  %s712_s23 = int_to_ptr.vmem [resolvable:$false] %s711_s23 }
  0x5c   : > { %572 = vmatpush1.bf16.msra.mxu1 %v571_v13  ;;  %v559_v22 = vpack.c.bf16 %v220_v20, %v216_v19  ;;  %v229_v25 = vld [vmem:[#allocation5 + $0xa8] sm:$0xff]  ;;  %558 = vmatprep.subr.bf16.mxu0 %v557_v17  ;;  %v575_v26 = vpack.c.bf16 %v222_v23, %v218_v21  ;;  %v227_v28 = vld [vmem:[#allocation5 + $0x98] sm:$0xff]  ;;  %v224_v30 = vld [vmem:[#allocation5 + $0x80] sm:$0xff]  ;;  %p709_p6 = pnand %p708_p4, %p900_p12  ;;  %s713_s30 = scalar_lea.vmem %s712_s23, 2048 }
  0x5d   : > { %574 = vmatprep.subr.bf16.mxu1 %v573_v18  ;;  %v561_v27 = vpack.c.bf16 %v229_v25, %v225_v24  ;;  %v231_v29 = vld [vmem:[#allocation5 + $0xb8] sm:$0xff]  ;;  %v228_v32 = vld [vmem:[#allocation5 + $0xa0] sm:$0xff]  ;;  %v226_v33 = vld [vmem:[#allocation5 + $0x90] sm:$0xff]  ;;  %p714_p10 = scmp.lt.s32.totalorder %s973_s26, %s712_s23  ;;  %p715_p13 = scmp.lt.s32.totalorder %s713_s30, %s707_s28 }
  0x5e   : > { %v577_v31 = vpack.c.bf16 %v231_v29, %v227_v28  ;;  %v230_v34 = vld [vmem:[#allocation5 + $0xb0] sm:$0xff]  ;;  %v563_v35 = vpack.c.bf16 %v228_v32, %v224_v30  ;;  %v233_v36 = vld [vmem:[#allocation5 + $0xc8] sm:$0xff]  ;;  %v235_v38 = vld [vmem:[#allocation5 + $0xd8] sm:$0xff]  ;;  %p710_p8 = pneg %p709_p6 }
  0x5f   : > { %560 = vmatpush1.bf16.msra.mxu0 %v559_v22  ;;  %v237_v37 = vld [vmem:[#allocation5 + $0xe8] sm:$0xff]  ;;  %v579_v39 = vpack.c.bf16 %v230_v34, %v226_v33  ;;  %v239_v41 = vld [vmem:[#allocation5 + $0xf8] sm:$0xff]  ;;  %v232_v42 = vld [vmem:[#allocation5 + $0xc0] sm:$0xff]  ;;  %p716_p3 = por %p715_p13, %p714_p10 }
  0x60   : > { %576 = vmatpush1.bf16.msra.mxu1 %v575_v26  ;;  %562 = vmatprep.subr.bf16.mxu0 %v561_v27  ;;  %v565_v40 = vpack.c.bf16 %v237_v37, %v233_v36  ;;  %v236_v43 = vld [vmem:[#allocation5 + $0xe0] sm:$0xff]  ;;  %v581_v44 = vpack.c.bf16 %v239_v41, %v235_v38  ;;  %v234_v45 = vld [vmem:[#allocation5 + $0xd0] sm:$0xff]  ;;  %v207_v50 = vld [vmem:[%s952_s9 + $0x8] sm:$0xff] }
  0x61   : > { %578 = vmatprep.subr.bf16.mxu1 %v577_v31  ;;  %v238_v46 = vld [vmem:[#allocation5 + $0xf0] sm:$0xff]  ;;  %v567_v47 = vpack.c.bf16 %v236_v43, %v232_v42  ;;  %v240_v54 = vld [vmem:[%s1024_s2] sm:$0xf]  ;;  %p717_p7 = pnand %p716_p3, %p710_p8 }
  0x62   : > { %v583_v48 = vpack.c.bf16 %v238_v46, %v234_v45  ;;  %v206_v49 = vld [vmem:[%s952_s9] sm:$0xff]  ;;  %v245_v58 = vrot.slane %v240_v54, %v244_v53  ;;  %v253_v59 = vrot.slane %v240_v54, %v252_v55  ;;  %v249_v60 = vrot.slane %v240_v54, %v248_v56 }
  0x63   : > { %564 = vmatpush1.bf16.msra.mxu0 %v563_v35  ;;  %v257_v61 = vrot.slane %v240_v54, %v256_v57 }
  0x64   : > { %580 = vmatpush1.bf16.msra.mxu1 %v579_v39  ;;  %566 = vmatprep.subr.bf16.mxu0 %v565_v40 }
  0x65   : > { %582 = vmatprep.subr.bf16.mxu1 %v581_v44 }
  0x67   : > { %568 = vmatpush1.bf16.msra.mxu0 %v567_v47 }
  0x68   : > { %584 = vmatpush1.bf16.msra.mxu1 %v583_v48 }
  0x6a   : > { %540 = vmatmul.mubr.msk.f32.vlgmr.msra.gmra.mrb[0].mxu0 %vm262_vm0, %v206_v49 }
  0x6b   : > { %542 = vmatmul.mubr.msk.f32.vlgmr.msra.gmra.mrb[0].mxu1 %vm262_vm0, %v206_v49  ;;  %339 = vmatprep.mubr.f32.mxu0 %v785_v0 }
  0x6c   : > { %416 = vmatprep.mubr.f32.mxu1 %v785_v0 }
  0x6e   : > { %541 = vmatmul.mubr.msk.f32.gmra.mrb[2].mxu0 %vm262_vm0, %v207_v50 }
  0x6f   : > { %543 = vmatmul.mubr.msk.f32.gmra.mrb[2].mxu1 %vm262_vm0, %v207_v50 }
 0x13d   : > { %v335_v62 = vpop.f32.mrb[0].mxu0 }
 0x13e   : > { %v336_v63 = vadd.f32 %v335_v62, %v245_v58  ;;  %v412_v0 = vpop.f32.mrb[0].mxu1  ;;  %v337_v1 = vpop.f32.mrb[1].mxu0 }
 0x13f   : > { %v413_v2 = vadd.f32 %v412_v0, %v253_v59  ;;  %v338_v3 = vadd.f32 %v337_v1, %v249_v60  ;;  %v414_v4 = vpop.f32.mrb[1].mxu1 }
 0x140   : > { %423 = vst [vmem:[%s203_s25] sm:$0xff] %v336_v63  ;;  %v415_v5 = vadd.f32 %v414_v4, %v257_v61 }
 0x141   : > { %425 = vst [vmem:[%s203_s25 + $0x10] sm:$0xff] %v413_v2  ;;  %424 = vst [vmem:[%s203_s25 + $0x8] sm:$0xff] %v338_v3  ;;  %v341_v6 = vpop.f32.mrb[2].mxu0 }
 0x142   : > { %426 = vst [vmem:[%s203_s25 + $0x18] sm:$0xff] %v415_v5  ;;  %v342_v7 = vadd.f32 %v341_v6, %v245_v58  ;;  %v418_v8 = vpop.f32.mrb[2].mxu1  ;;  %v343_v9 = vpop.f32.mrb[3].mxu0 }
 0x143   : > { %v419_v10 = vadd.f32 %v418_v8, %v253_v59  ;;  %v344_v11 = vadd.f32 %v343_v9, %v249_v60  ;;  %v420_v12 = vpop.f32.mrb[3].mxu1 }
 0x144   : > { %427 = vst [vmem:[%s203_s25 + $0x20] sm:$0xff] %v342_v7  ;;  %v421_v13 = vadd.f32 %v420_v12, %v257_v61 }
 0x145   : > { %429 = vst [vmem:[%s203_s25 + $0x30] sm:$0xff] %v419_v10  ;;  %428 = vst [vmem:[%s203_s25 + $0x28] sm:$0xff] %v344_v11 }
 0x146   : > { %430 = vst [vmem:[%s203_s25 + $0x38] sm:$0xff] %v421_v13 }
 0x147   : > { %720 = shalt.err (!%p717_p7)
}
 0x148   : > { %s721_s22 = scalar_lea.hbm %s978_s16, 1024  ;;  %s725_s9 = scalar_lea.hbm %s1025_s3, 2048 }
 0x149   : > { %p722_p9 = scmp.ne.s32.totalorder %s978_s16, %s721_s22  ;;  %p726_p5 = scmp.lt.u32.totalorder %s978_s16, %s1025_s3 }
 0x14a   : > { %p727_p11 = scmp.lt.u32.totalorder %s725_s9, %s721_s22  ;;  %p729_p4 = scmp.lt.u32.totalorder %s721_s22, %s978_s16 }
 0x14b   : > { %p723_p2 = pnand %p722_p9, %p900_p12 }
 0x14c   : > { %p728_p1 = por %p727_p11, %p726_p5 }
 0x14d   : > { %p724_p0 = pneg %p723_p2 }
 0x14e   : > { %p730_p6 = por %p729_p4, %p728_p1 }
 0x150   : > { %p731_p8 = pnand %p730_p6, %p724_p0 }
 0x152   : > { %734 = shalt.err (!%p731_p8)
}
 0x153   : > { %s787_s4 = smov 512   ;;  %s788_s25 = smov 32  }
 0x154   : > { %591 = dma.vmem_to_hbm [thread:$0]  (%p900_p12), %s973_s26, 1024, %s978_s16, %s432_s27, %s787_s4, %s787_s4, %s788_s25  }
 0x155 PF: > { %s461_s5 = sand.u32 1, %s765_s12   ;;  %p1040_p10 = scmp.ne.s32.totalorder %s1030_s19, 0 }
 0x156   : > { %p1041_p13 = scmp.ge.s32.totalorder %s777_s15, 2  ;;  %s462_s10 = scalar_lea.sflag [#allocation4], %s461_s5 }
 0x158   : > { %p602_p3 = pnand %p1041_p13, %p1040_p10 }
 0x15a   : > { %760 = dma.done.wait (!%p602_p3), %s462_s10, 1024  }
 0x15b   : > { %762 = vsyncadd (!%p602_p3), %s462_s10, 4294966272  ;;  %p17_p7 = scmp.ge.s32.totalorder %s865_s24, 4   ;;  %s1042_s12 = smov %s769_s13 }
 0x15c   : > { %s1043_s13 = smov %s773_s14  ;;  %s1044_s14 = smov %s896_s17 }
 0x15d   : > { %s1045_s15 = smov %s865_s24  ;;  %19 = sbr.rel (!%p17_p7) target bundleno = 6 (0x6), region = 81 }
 0x164   :  { %467 = vsyncpa [#allocation3], 1 }
 0x165   :  { %469 = vsyncpa [#allocation3 + $0x1], 1 }
 0x166   :  { %470 = vsyncpa [#allocation6], 1 }
 0x167   :  { %471 = vsyncpa [#allocation4], 1 }
 0x168   :  { %473 = vsyncpa [#allocation4 + $0x1], 1 }

</bundles_post_ra>
